<compile_context>
chip_gen: v7x
topology: tpu7x:2x2x1
jax: 0.10.0
libtpu: 0.0.40
codegen_flags: <defaults>
</compile_context>

<pallas_src>
import jax
import jax.numpy as jnp
from jax.experimental import pallas as pl
from jax.experimental.pallas import tpu as pltpu

_EPS = 1e-12


def _feature_map_kernel(text_ref, image_ref, out_ref):
    # text_ref:  (B, I, 1)   text embedding along the sublane axis
    # image_ref: (B, 1, TJ)  image-embedding tile along the lane axis
    # out_ref:   (B, I, TJ)
    t = text_ref[...].astype(jnp.float32)      # (B, I, 1)
    im = image_ref[...].astype(jnp.float32)    # (B, 1, TJ)

    # ||text[b, :]||_2 : O(B*I) cross-sublane reduce (XLU) — tiny.
    t_norm = jnp.sqrt(jnp.sum(t * t, axis=1, keepdims=True))       # (B, 1, 1)

    # Exact column norm of the outer product, computed analytically:
    #   ||shared[b, :, j]||_2 = |image[b, j]| * ||text[b, :]||_2
    # Joint clamp preserved: denom = max(|im| * ||t||, eps).
    denom = jnp.maximum(jnp.abs(im) * t_norm, _EPS)                # (B, 1, TJ)
    im_scaled = im / denom                                         # O(B*TJ) divides only

    # One multiply per output element; cast on the store.
    out_ref[...] = (t * im_scaled).astype(out_ref.dtype)


def _choose_tile_j(B, I, J, out_elem_bytes, budget_bytes=6 * 1024 * 1024):
    """Largest lane-dense (multiple-of-128) J tile whose output block fits the budget."""
    if J % 128 != 0:
        return J  # keep the full (hence legal) last dim for ragged J
    bytes_per_j = max(1, B * I * out_elem_bytes)
    tj = (budget_bytes // bytes_per_j) // 128 * 128
    tj = max(128, tj)
    return min(J, tj)


def feature_map_generator(text_embedding, image_embedding):
    """text_embedding: (B, I), image_embedding: (B, J) -> (B, I, J)."""
    B, I = text_embedding.shape
    B2, J = image_embedding.shape
    assert B == B2, "batch dims must match"

    out_dtype = text_embedding.dtype
    out_elem_bytes = jnp.dtype(out_dtype).itemsize
    in_elem_bytes = jnp.dtype(text_embedding.dtype).itemsize
    tj = _choose_tile_j(B, I, J, out_elem_bytes)
    grid = (pl.cdiv(J, tj),)

    # Glue reshapes (plain JAX): explicit broadcast axes so the in-kernel outer
    # product is a pure broadcasted multiply with no relayout.
    t3 = text_embedding.reshape(B, I, 1)
    i3 = image_embedding.reshape(B, 1, J)

    cost = pl.CostEstimate(
        flops=2 * B * I * J,  # ~1 mul/element + small epilogue
        transcendentals=B,    # one sqrt per batch row
        bytes_accessed=(B * I + B * J) * in_elem_bytes + B * I * J * out_elem_bytes,
    )

    return pl.pallas_call(
        _feature_map_kernel,
        out_shape=jax.ShapeDtypeStruct((B, I, J), out_dtype),
        grid=grid,
        in_specs=[
            pl.BlockSpec((B, I, 1), lambda j: (0, 0, 0)),
            pl.BlockSpec((B, 1, tj), lambda j: (0, 0, j)),
        ],
        out_specs=pl.BlockSpec((B, I, tj), lambda j: (0, 0, j)),
        compiler_params=pltpu.CompilerParams(
            dimension_semantics=("parallel",),
            vmem_limit_bytes=32 * 1024 * 1024,
        ),
        cost_estimate=cost,
    )(t3, i3)


def _reference(text_embedding, image_embedding):
    """Pure-JAX reference replicating the PyTorch forward (F.normalize, dim=1)."""
    shared = jnp.einsum("bi,bj->bij", text_embedding, image_embedding)
    norm = jnp.sqrt(jnp.sum(shared * shared, axis=1, keepdims=True))
    return shared / jnp.maximum(norm, _EPS)


if __name__ == "__main__":
    key = jax.random.PRNGKey(0)
    k_text, k_img = jax.random.split(key)

    B, I, J = 2, 16, 128  # small shapes consistent with (B, text_dim), (B, image_dim)
    text_embedding = jax.random.normal(k_text, (B, I), dtype=jnp.float32)
    image_embedding = jax.random.normal(k_img, (B, J), dtype=jnp.float32)

    out = feature_map_generator(text_embedding, image_embedding)
    out = jax.block_until_ready(out)

    ref = _reference(text_embedding, image_embedding)
    assert out.shape == (B, I, J)
    assert jnp.allclose(out, ref, atol=1e-5, rtol=1e-5), "mismatch vs reference"

    print("KERNEL_OK")
</pallas_src>

<mosaic_0001>
module attributes {stable_mosaic.version = 11 : i64} {
  func.func @_feature_map_kernel(%arg0: i32, %arg1: memref<2x16x1xf32, #tpu.memory_space<vmem>>, %arg2: memref<2x1x128xf32, #tpu.memory_space<vmem>>, %arg3: memref<2x16x128xf32, #tpu.memory_space<vmem>>) attributes {dimension_semantics = [#tpu.dimension_semantics<parallel>], iteration_bounds = array<i64: 1>, scalar_prefetch = 0 : i64, scratch_operands = 0 : i64, tpu.core_type = #tpu.core_type<tc>, window_params = [{pipeline_mode = #tpu.pipeline_mode<synchronous>, transform_indices = @transform_0, window_bounds = array<i64: 2, 16, 1>}, {transform_indices = @transform_1, window_bounds = array<i64: 2, 1, 128>}, {transform_indices = @transform_2, window_bounds = array<i64: 2, 16, 128>}]} {
    %c0 = arith.constant 0 : index
    %c0_0 = arith.constant 0 : index
    %c0_1 = arith.constant 0 : index
    %0 = vector.load %arg1[%c0, %c0_0, %c0_1] : memref<2x16x1xf32, #tpu.memory_space<vmem>>, vector<2x16x1xf32>
    %c0_2 = arith.constant 0 : index
    %c0_3 = arith.constant 0 : index
    %c0_4 = arith.constant 0 : index
    %1 = vector.load %arg2[%c0_2, %c0_3, %c0_4] : memref<2x1x128xf32, #tpu.memory_space<vmem>>, vector<2x1x128xf32>
    %2 = arith.mulf %0, %0 : vector<2x16x1xf32>
    %cst = arith.constant dense<0.000000e+00> : vector<2x1xf32>
    %3 = vector.multi_reduction <add>, %2, %cst [1] : vector<2x16x1xf32> to vector<2x1xf32>
    %4 = vector.shape_cast %3 : vector<2x1xf32> to vector<2x1x1xf32>
    %5 = math.sqrt %4 : vector<2x1x1xf32>
    %6 = math.absf %1 : vector<2x1x128xf32>
    %7 = vector.broadcast %5 : vector<2x1x1xf32> to vector<2x1x128xf32>
    %8 = arith.mulf %6, %7 : vector<2x1x128xf32>
    %cst_5 = arith.constant 9.99999996E-13 : f32
    %9 = vector.broadcast %cst_5 : f32 to vector<2x1x128xf32>
    %10 = arith.maximumf %8, %9 : vector<2x1x128xf32>
    %11 = arith.divf %1, %10 : vector<2x1x128xf32>
    %12 = vector.broadcast %0 : vector<2x16x1xf32> to vector<2x16x128xf32>
    %13 = vector.broadcast %11 : vector<2x1x128xf32> to vector<2x16x128xf32>
    %14 = arith.mulf %12, %13 : vector<2x16x128xf32>
    %c0_6 = arith.constant 0 : index
    %c0_7 = arith.constant 0 : index
    %c0_8 = arith.constant 0 : index
    %15 = vector.load %arg3[%c0_6, %c0_7, %c0_8] : memref<2x16x128xf32, #tpu.memory_space<vmem>>, vector<2x16x128xf32>
    tpu.vector_store %arg3[%c0_6, %c0_7, %c0_8], %14 {strides = array<i32>} : memref<2x16x128xf32, #tpu.memory_space<vmem>>, vector<2x16x128xf32>,
    return
  }
  func.func @transform_0(%arg0: i32) -> (i32, i32, i32) {
    %c0_i32 = arith.constant 0 : i32
    %c0_i32_0 = arith.constant 0 : i32
    %c0_i32_1 = arith.constant 0 : i32
    %c0_i32_2 = arith.constant 0 : i32
    return %c0_i32, %c0_i32_0, %c0_i32_1 : i32, i32, i32
  }
  func.func @transform_1(%arg0: i32) -> (i32, i32, i32) {
    %c0_i32 = arith.constant 0 : i32
    %c0_i32_0 = arith.constant 0 : i32
    %c0_i32_1 = arith.constant 0 : i32
    return %c0_i32, %c0_i32_0, %arg0 : i32, i32, i32
  }
  func.func @transform_2(%arg0: i32) -> (i32, i32, i32) {
    %c0_i32 = arith.constant 0 : i32
    %c0_i32_0 = arith.constant 0 : i32
    %c0_i32_1 = arith.constant 0 : i32
    return %c0_i32, %c0_i32_0, %arg0 : i32, i32, i32
  }
}

</mosaic_0001>

<bundles_post_ra>
// kernel: tpu_custom_call.1
= control target key start
LH: loop header
LB: loop body
LE: loop exit
PB: predicated region body
PF: predicated region fallthrough
CT: control target
= control target key end

     0   :  { %vm22_vm0 = vcmask 7168   ;;  %v169_v3 = vmov 0   ;;  %s222_s0 = inlined_call_operand.vmem [shape: f32[2,16,1], index: 0, kind: input, shape index: {}]   ;;  %s223_s1 = inlined_call_operand.vmem [shape: f32[2,1,128], index: 1, kind: input, shape index: {}]   ;;  %s224_s2 = inlined_call_operand.hbm [shape: f32[2,16,128], index: 2, kind: output, shape index: {}]  }
   0x1   :  { %v12_v0 = vld [vmem:[%s222_s0] sm:$0xff]  ;;  %v13_v1 = vld [vmem:[%s222_s0 + $0x8] sm:$0xff]  ;;  %v14_v2 = vld [vmem:[%s222_s0 + $0x10] sm:$0xff]  ;;  %135 = vset.pattern.permute.xlu0 %v169_v3  ;;  %136 = vset.pattern.permute.xlu1 %v169_v3 }
   0x2   :  { %v18_v4 = vmul.f32 %v12_v0, %v12_v0  ;;  %v19_v5 = vmul.f32 %v13_v1, %v13_v1  ;;  %v15_v6 = vld [vmem:[%s222_s0 + $0x18] sm:$0xff]  ;;  %v20_v7 = vmul.f32 %v14_v2, %v14_v2 }
   0x3   :  { %7 = vsyncpa [#allocation3], 0  ;;  %v21_v8 = vmul.f32 %v15_v6, %v15_v6  ;;  %77 = vperm.xlu1 %136, %v12_v0   ;;  %v16_v37 = vld [vmem:[%s223_s1] sm:$0x1]  ;;  %v17_v39 = vld [vmem:[%s223_s1 + $0x1] sm:$0x1]  ;;  %v97_v46 = vlaneseq }
   0x4   :  { %v23_v9 = vsel %vm22_vm0, %v18_v4, 0.0  ;;  %v24_v10 = vsel %vm22_vm0, %v19_v5, 0.0  ;;  %v32_v11 = vsel %vm22_vm0, %v20_v7, 0.0  ;;  %v55_v38 = vand.u32 2147483647, %v16_v37  ;;  %s170_s1 = smov [#allocation2]  }
   0x5   :  { %v25_v12 = vadd.f32 %v24_v10, %v23_v9  ;;  %v33_v13 = vsel %vm22_vm0, %v21_v8, 0.0  ;;  %v56_v42 = vand.u32 2147483647, %v17_v39  ;;  %v98_v48 = vshrl.u32 %v97_v46, 7  ;;  %s120_s20 = sshll.u32 %s170_s1, 4  ;;  %s121_s20 = int_to_ptr.vmem [resolvable:$true] %s120_s20 }
   0x6   :  { %v34_v14 = vadd.f32 %v33_v13, %v32_v11  ;;  %s145_s21 = scalar_lea.vmem %s121_s20, 512  ;;  %p150_p1 = scmp.lt.s32.totalorder %s121_s20, %s121_s20 }
   0x7   :  { %v26_v15 = vrot.slane %v25_v12, 4  ;;  %82 = vperm.xlu1 %136, %v13_v1   ;;  %v99_v50 = vsub.s32 0, %v98_v48  ;;  %p146_p0 = scmp.ne.s32.totalorder %s121_s20, %s145_s21  ;;  %p151_p2 = scmp.lt.s32.totalorder %s145_s21, %s145_s21 }
   0x8   :  { %v35_v16 = vrot.slane %v34_v14, 4 }
   0x9   :  { %v27_v17 = vadd.f32 %v26_v15, %v25_v12  ;;  %p152_p3 = por %p151_p2, %p150_p1 }
   0xa   :  { %v36_v18 = vadd.f32 %v35_v16, %v34_v14 }
   0xb   :  { %v28_v19 = vrot.slane %v27_v17, 2  ;;  %92 = vperm.xlu1 %136, %v15_v6   ;;  %p153_p4 = pnand %p152_p3, %p146_p0 }
   0xc   :  { %v37_v20 = vrot.slane %v36_v18, 2 }
   0xd   :  { %v29_v21 = vadd.f32 %v28_v19, %v27_v17 }
   0xe   :  { %v38_v22 = vadd.f32 %v37_v20, %v36_v18 }
   0xf   :  { %v30_v23 = vrot.slane %v29_v21, 1 }
  0x10   :  { %v39_v24 = vrot.slane %v38_v22, 1 }
  0x11   :  { %v31_v25 = vadd.f32 %v30_v23, %v29_v21 }
  0x12   :  { %v40_v26 = vadd.f32 %v39_v24, %v38_v22 }
  0x13   :  { %137 = vrsqrt.f32 %v31_v25  ;;  %vm43_vm1 = vcmp.eq.f32.partialorder %v31_v25, inf  ;;  %v46_v28 = vand.u32 2147483648, %v31_v25  ;;  %vm45_vm2 = vcmp.eq.f32.partialorder %v31_v25, 0.0 }
  0x14   :  { %139 = vrsqrt.f32 %v40_v26  ;;  %vm50_vm3 = vcmp.eq.f32.partialorder %v40_v26, inf  ;;  %v53_v32 = vand.u32 2147483648, %v40_v26  ;;  %vm52_vm4 = vcmp.eq.f32.partialorder %v40_v26, 0.0 }
  0x1d   :  { %v138_v27 = vpop.eup %137 }
  0x1e   :  { %v140_v29 = vpop.eup %139  ;;  %v42_v30 = vmul.f32 %v138_v27, %v31_v25 }
  0x1f   :  { %v49_v31 = vmul.f32 %v140_v29, %v40_v26 }
  0x20   :  { %v44_v33 = vsel %vm43_vm1, %v31_v25, %v42_v30 }
  0x21   :  { %v47_v34 = vsel %vm45_vm2, %v46_v28, %v44_v33  ;;  %v51_v35 = vsel %vm50_vm3, %v40_v26, %v49_v31 }
  0x22   :  { %59 = vperm.xlu0 %135, %v47_v34   ;;  %v54_v36 = vsel %vm52_vm4, %v53_v32, %v51_v35 }
  0x26   :  { %64 = vperm.xlu0 %135, %v54_v36  }
  0x2a   :  { %87 = vperm.xlu0 %135, %v14_v2  }
  0x82   :  { %v78_v49 = vpop.permute.xlu1 %77 }
  0x86   :  { %v83_v53 = vpop.permute.xlu1 %82 }
  0x8a   :  { %v93_v61 = vpop.permute.xlu1 %92 }
  0xa1   :  { %v60_v40 = vpop.permute.xlu0 %59 }
  0xa2   :  { %v67_v41 = vmul.f32 %v60_v40, %v55_v38 }
  0xa4   :  { %v69_v43 = vmax.f32 %v67_v41, 1e-12 }
  0xa5   :  { %v65_v44 = vpop.permute.xlu0 %64 }
  0xa6   :  { %141 = vrcp.f32 %v69_v43  ;;  %v68_v45 = vmul.f32 %v65_v44, %v56_v42 }
  0xa8   :  { %v70_v47 = vmax.f32 %v68_v45, 1e-12 }
  0xa9   :  { %v88_v60 = vpop.permute.xlu0 %87 }
  0xaa   :  { %143 = vrcp.f32 %v70_v47 }
  0xb0   :  { %v142_v51 = vpop.eup %141 }
  0xb1   :  { %v72_v52 = vmul.f32 %v142_v51, %v16_v37 }
  0xb3   :  { %v100_v54 = vrot.slane %v72_v52, %v99_v50 }
  0xb4   :  { %v144_v55 = vpop.eup %143 }
  0xb5   :  { %v107_v56 = vmul.f32 %v100_v54, %v78_v49  ;;  %v74_v57 = vmul.f32 %v144_v55, %v17_v39  ;;  %v108_v58 = vmul.f32 %v100_v54, %v83_v53 }
  0xb7   :  { %111 = vst [vmem:[#allocation2] sm:$0xff] %v107_v56  ;;  %v104_v59 = vrot.slane %v74_v57, %v99_v50  ;;  %112 = vst [vmem:[#allocation2 + $0x8] sm:$0xff] %v108_v58 }
  0xb9   :  { %v109_v62 = vmul.f32 %v104_v59, %v88_v60  ;;  %v110_v63 = vmul.f32 %v104_v59, %v93_v61 }
  0xbb   :  { %113 = vst [vmem:[#allocation2 + $0x10] sm:$0xff] %v109_v62  ;;  %114 = vst [vmem:[#allocation2 + $0x18] sm:$0xff] %v110_v63 }
  0xbc   :  { %156 = shalt.err (!%p153_p4)
}
  0xbd   :  { %s157_s24 = scalar_lea.hbm %s224_s2, 512 }
  0xbe   :  { %p158_p5 = scmp.ne.s32.totalorder %s224_s2, %s157_s24  ;;  %p161_p6 = scmp.lt.u32.totalorder %s157_s24, %s224_s2 }
  0xc0   :  { %p163_p7 = pnand %p161_p6, %p158_p5 }
  0xc2   :  { %166 = shalt.err (!%p163_p7)
}
  0xc3   :  { %s171_s29 = smov 128   ;;  %s172_s30 = smov 8  }
  0xc4   :  { %126 = dma.vmem_to_hbm [thread:$0]  %s121_s20, 512, %s224_s2, [#allocation3], %s171_s29, %s171_s29, %s172_s30  }
  0xc5   :  { %167 = dma.done.wait [#allocation3], 512  }
  0xc6   :  { %168 = vsyncadd [#allocation3], 4294966784 }
  0xc7   :  { %130 = vsyncpa [#allocation3], 1 }

</bundles_post_ra>
